<compile_context>
chip_gen: v7x
topology: tpu7x:2x2x1
jax: 0.10.0
libtpu: 0.0.40
codegen_flags: <defaults>
</compile_context>

<pallas_src>
import functools

import jax
import jax.numpy as jnp
from jax.experimental import pallas as pl
from jax.experimental.pallas import tpu as pltpu


def alphazero_fwd_kernel(x_ref, w1_ref, b1_ref, wh_ref, bh_ref, out_ref):
    # h = relu(x @ W1 + b1)                       -> (B_pad, hid_pad)
    h = jnp.dot(x_ref[...], w1_ref[...],
                preferred_element_type=jnp.float32) + b1_ref[...]
    h = jnp.maximum(h, 0.0)
    # fused heads: [policy | value | pad] = h @ Wh + bh   (lane-dense store)
    out_ref[...] = (jnp.dot(h, wh_ref[...],
                            preferred_element_type=jnp.float32)
                    + bh_ref[...]).astype(out_ref.dtype)


def _round_up(n, m):
    return ((n + m - 1) // m) * m


@functools.partial(jax.jit, static_argnames=())
def alphazero_forward(x, params):
    """Returns (v, p) exactly like AlphaZeroModel.forward.

    params = (w1, b1, wp, bp, wv, bv) with weights stored as (in, out) and
    biases as (1, out).
    """
    w1, b1, wp, bp, wv, bv = params
    B, input_size = x.shape
    hidden_size, action_size = wp.shape

    # Tile-aligned (zero-padded) shapes: unmasked (8, 128) vregs everywhere.
    B_pad = _round_up(B, 8)                    # f32 sublane packing
    in_pad = _round_up(input_size, 128)
    hid_pad = _round_up(hidden_size, 128)
    out_width = action_size + 1                # [policy logits | value]
    out_pad = _round_up(out_width, 128)

    f32 = jnp.float32
    x_p = jnp.zeros((B_pad, in_pad), f32).at[:B, :input_size].set(x.astype(f32))
    w1_p = (jnp.zeros((in_pad, hid_pad), f32)
            .at[:input_size, :hidden_size].set(w1.astype(f32)))
    b1_p = (jnp.zeros((1, hid_pad), f32)
            .at[:, :hidden_size].set(b1.reshape(1, -1).astype(f32)))

    # Fused head weights / bias: value column appended after the policy block,
    # zero-padded up to out_pad lanes.
    wh = jnp.zeros((hid_pad, out_pad), f32)
    wh = wh.at[:hidden_size, :action_size].set(wp.astype(f32))
    wh = wh.at[:hidden_size, action_size:action_size + 1].set(wv.astype(f32))
    bh = jnp.zeros((1, out_pad), f32)
    bh = bh.at[:, :action_size].set(bp.reshape(1, -1).astype(f32))
    bh = bh.at[:, action_size:action_size + 1].set(bv.reshape(1, -1).astype(f32))

    vmem = pl.BlockSpec(memory_space=pltpu.MemorySpace.VMEM)
    out = pl.pallas_call(
        alphazero_fwd_kernel,
        out_shape=jax.ShapeDtypeStruct((B_pad, out_pad), f32),
        in_specs=[vmem] * 5,
        out_specs=vmem,
    )(x_p, w1_p, b1_p, wh, bh)

    # Wrapper-side slicing (cheap XLA): drop padding, split policy / value.
    p = out[:B, :action_size]
    v = out[:B, action_size:action_size + 1]
    return v, p


def init_params(key, input_size, hidden_size, action_size):
    """Deterministic synthetic parameter init (shapes match nn.Linear math)."""
    k1, k2, k3, k4, k5, k6 = jax.random.split(key, 6)
    # Stored as (in, out); biases kept 2D (1, out).
    w1 = jax.random.normal(k1, (input_size, hidden_size), jnp.float32) * 0.1
    b1 = jax.random.normal(k2, (1, hidden_size), jnp.float32) * 0.01
    wp = jax.random.normal(k3, (hidden_size, action_size), jnp.float32) * 0.1
    bp = jax.random.normal(k4, (1, action_size), jnp.float32) * 0.01
    wv = jax.random.normal(k5, (hidden_size, 1), jnp.float32) * 0.1
    bv = jax.random.normal(k6, (1, 1), jnp.float32) * 0.01
    return (w1, b1, wp, bp, wv, bv)


def reference_forward(x, params):
    w1, b1, wp, bp, wv, bv = params
    h = jnp.maximum(x @ w1 + b1, 0.0)
    p = h @ wp + bp
    v = h @ wv + bv
    return v, p


if __name__ == "__main__":
    # Small shapes consistent with the module's forward (pure MLP on vectors).
    batch = 8
    input_size = 16
    hidden_size = 32
    action_size = 8

    key = jax.random.PRNGKey(0)
    kx, kp = jax.random.split(key)
    x = jax.random.normal(kx, (batch, input_size), jnp.float32)
    params = init_params(kp, input_size, hidden_size, action_size)

    v, p = alphazero_forward(x, params)
    jax.block_until_ready((v, p))

    # Cross-check against a plain JAX reference of the same math.
    v_ref, p_ref = reference_forward(x, params)
    assert v.shape == (batch, 1) and p.shape == (batch, action_size)
    assert jnp.allclose(v, v_ref, atol=1e-5, rtol=1e-5)
    assert jnp.allclose(p, p_ref, atol=1e-5, rtol=1e-5)

    # TODO(synk): training-side methods (loss / softmax / Adam loop) are not
    # kernelized; only the forward pass is implemented in Pallas.

    print("KERNEL_OK")
</pallas_src>

<mosaic_0001>
module attributes {stable_mosaic.version = 11 : i64} {
  func.func @alphazero_fwd_kernel(%arg0: memref<8x128xf32, #tpu.memory_space<vmem>>, %arg1: memref<128x128xf32, #tpu.memory_space<vmem>>, %arg2: memref<1x128xf32, #tpu.memory_space<vmem>>, %arg3: memref<128x128xf32, #tpu.memory_space<vmem>>, %arg4: memref<1x128xf32, #tpu.memory_space<vmem>>, %arg5: memref<8x128xf32, #tpu.memory_space<vmem>>) attributes {dimension_semantics = [], scalar_prefetch = 0 : i64, scratch_operands = 0 : i64, tpu.core_type = #tpu.core_type<tc>} {
    %c0 = arith.constant 0 : index
    %c0_0 = arith.constant 0 : index
    %0 = vector.load %arg0[%c0, %c0_0] : memref<8x128xf32, #tpu.memory_space<vmem>>, vector<8x128xf32>
    %c0_1 = arith.constant 0 : index
    %c0_2 = arith.constant 0 : index
    %1 = vector.load %arg1[%c0_1, %c0_2] : memref<128x128xf32, #tpu.memory_space<vmem>>, vector<128x128xf32>
    %cst = arith.constant dense<0.000000e+00> : vector<8x128xf32>
    %2 = tpu.matmul %0, %1, %cst {dimension_numbers = #tpu.dot_dimension_numbers<[1], [0], [0], [1], [0, 0, 1, 1], [], []>} : vector<8x128xf32>, vector<128x128xf32>, vector<8x128xf32> -> vector<8x128xf32>
    %c0_3 = arith.constant 0 : index
    %c0_4 = arith.constant 0 : index
    %3 = vector.load %arg2[%c0_3, %c0_4] : memref<1x128xf32, #tpu.memory_space<vmem>>, vector<1x128xf32>
    %4 = vector.broadcast %3 : vector<1x128xf32> to vector<8x128xf32>
    %5 = arith.addf %2, %4 : vector<8x128xf32>
    %cst_5 = arith.constant 0.000000e+00 : f32
    %6 = vector.broadcast %cst_5 : f32 to vector<8x128xf32>
    %7 = arith.maximumf %5, %6 : vector<8x128xf32>
    %c0_6 = arith.constant 0 : index
    %c0_7 = arith.constant 0 : index
    %8 = vector.load %arg3[%c0_6, %c0_7] : memref<128x128xf32, #tpu.memory_space<vmem>>, vector<128x128xf32>
    %cst_8 = arith.constant dense<0.000000e+00> : vector<8x128xf32>
    %9 = tpu.matmul %7, %8, %cst_8 {dimension_numbers = #tpu.dot_dimension_numbers<[1], [0], [0], [1], [0, 0, 1, 1], [], []>} : vector<8x128xf32>, vector<128x128xf32>, vector<8x128xf32> -> vector<8x128xf32>
    %c0_9 = arith.constant 0 : index
    %c0_10 = arith.constant 0 : index
    %10 = vector.load %arg4[%c0_9, %c0_10] : memref<1x128xf32, #tpu.memory_space<vmem>>, vector<1x128xf32>
    %11 = vector.broadcast %10 : vector<1x128xf32> to vector<8x128xf32>
    %12 = arith.addf %9, %11 : vector<8x128xf32>
    %c0_11 = arith.constant 0 : index
    %c0_12 = arith.constant 0 : index
    %13 = vector.load %arg5[%c0_11, %c0_12] : memref<8x128xf32, #tpu.memory_space<vmem>>, vector<8x128xf32>
    tpu.vector_store %arg5[%c0_11, %c0_12], %12 {strides = array<i32>} : memref<8x128xf32, #tpu.memory_space<vmem>>, vector<8x128xf32>,
    return
  }
}

</mosaic_0001>

<bundles_post_ra>
// kernel: alphazero_forward.1
= control target key start
LH: loop header
LB: loop body
LE: loop exit
PB: predicated region body
PF: predicated region fallthrough
CT: control target
= control target key end

     0   :  { %v370_v0 = vmov 0.0|0.0   ;;  %vm371_vm0 = vmmov 0   ;;  %v372_v4 = vmov 0.0   ;;  %s527_s1 = inlined_call_operand.vmem [shape: f32[128,128], index: 1, kind: input, shape index: {}]   ;;  %s528_s3 = inlined_call_operand.vmem [shape: f32[128,128], index: 3, kind: input, shape index: {}]   ;;  %s529_s0 = inlined_call_operand.vmem [shape: f32[8,128], index: 0, kind: input, shape index: {}]   ;;  %s530_s2 = inlined_call_operand.vmem [shape: f32[1,128], index: 2, kind: input, shape index: {}]   ;;  %s531_s4 = inlined_call_operand.vmem [shape: f32[1,128], index: 4, kind: input, shape index: {}]   ;;  %s532_s5 = inlined_call_operand.vmem [shape: f32[8,128], index: 5, kind: output, shape index: {}]  }
   0x1   :  { %319 = vmatprep.subr.bf16.mxu0 %v370_v0  ;;  %v21_v1 = vld [vmem:[%s527_s1] sm:$0xff]  ;;  %v22_v2 = vld [vmem:[%s527_s1 + $0x8] sm:$0xff]  ;;  %v23_v3 = vld [vmem:[%s527_s1 + $0x10] sm:$0xff]  ;;  %281 = vmatprep.mubr.msk.f32.mxu0 %vm371_vm0, %v372_v4 }
   0x2   :  { %v320_v5 = vpack.c.bf16 %v22_v2, %v21_v1  ;;  %v24_v6 = vld [vmem:[%s527_s1 + $0x18] sm:$0xff]  ;;  %343 = vmatprep.subr.bf16.mxu1 %v370_v0  ;;  %316 = vmatprep.mubr.msk.f32.mxu1 %vm371_vm0, %v372_v4  ;;  %v25_v8 = vld [vmem:[%s527_s1 + $0x20] sm:$0xff]  ;;  %v26_v9 = vld [vmem:[%s527_s1 + $0x28] sm:$0xff] }
   0x3   :  { %v323_v7 = vpack.c.bf16 %v24_v6, %v23_v3  ;;  %v115_v10 = vld [vmem:[%s528_s3] sm:$0xff]  ;;  %v116_v11 = vld [vmem:[%s528_s3 + $0x8] sm:$0xff]  ;;  %v117_v12 = vld [vmem:[%s528_s3 + $0x10] sm:$0xff]  ;;  %v326_v14 = vpack.c.bf16 %v26_v9, %v25_v8 }
   0x4   :  { %321 = vmatpush3.bf16.msra.mxu0 %v320_v5  ;;  %v118_v13 = vld [vmem:[%s528_s3 + $0x18] sm:$0xff]  ;;  %v344_v15 = vpack.c.bf16 %v116_v11, %v115_v10  ;;  %v27_v16 = vld [vmem:[%s527_s1 + $0x30] sm:$0xff]  ;;  %v119_v19 = vld [vmem:[%s528_s3 + $0x20] sm:$0xff] }
   0x5   :  { %322 = vmatprep.subr.bf16.mxu0 %v370_v0  ;;  %v28_v17 = vld [vmem:[%s527_s1 + $0x38] sm:$0xff]  ;;  %v347_v18 = vpack.c.bf16 %v118_v13, %v117_v12  ;;  %v120_v20 = vld [vmem:[%s528_s3 + $0x28] sm:$0xff]  ;;  %v29_v22 = vld [vmem:[%s527_s1 + $0x40] sm:$0xff] }
   0x6   :  { %345 = vmatpush3.bf16.msra.mxu1 %v344_v15  ;;  %v329_v21 = vpack.c.bf16 %v28_v17, %v27_v16  ;;  %v30_v23 = vld [vmem:[%s527_s1 + $0x48] sm:$0xff]  ;;  %v350_v24 = vpack.c.bf16 %v120_v20, %v119_v19  ;;  %v121_v25 = vld [vmem:[%s528_s3 + $0x30] sm:$0xff]  ;;  %v122_v26 = vld [vmem:[%s528_s3 + $0x38] sm:$0xff] }
   0x7   :  { %346 = vmatprep.subr.bf16.mxu1 %v370_v0  ;;  %v332_v27 = vpack.c.bf16 %v30_v23, %v29_v22  ;;  %v31_v28 = vld [vmem:[%s527_s1 + $0x50] sm:$0xff]  ;;  %v32_v29 = vld [vmem:[%s527_s1 + $0x58] sm:$0xff]  ;;  %v353_v30 = vpack.c.bf16 %v122_v26, %v121_v25  ;;  %v123_v31 = vld [vmem:[%s528_s3 + $0x40] sm:$0xff] }
   0x8   :  { %324 = vmatpush3.bf16.msra.mxu0 %v323_v7  ;;  %v124_v32 = vld [vmem:[%s528_s3 + $0x48] sm:$0xff]  ;;  %v335_v33 = vpack.c.bf16 %v32_v29, %v31_v28  ;;  %v33_v34 = vld [vmem:[%s527_s1 + $0x60] sm:$0xff]  ;;  %v125_v37 = vld [vmem:[%s528_s3 + $0x50] sm:$0xff] }
   0x9   :  { %325 = vmatprep.subr.bf16.mxu0 %v370_v0  ;;  %v34_v35 = vld [vmem:[%s527_s1 + $0x68] sm:$0xff]  ;;  %v356_v36 = vpack.c.bf16 %v124_v32, %v123_v31  ;;  %v126_v38 = vld [vmem:[%s528_s3 + $0x58] sm:$0xff]  ;;  %v35_v40 = vld [vmem:[%s527_s1 + $0x70] sm:$0xff] }
   0xa   :  { %348 = vmatpush3.bf16.msra.mxu1 %v347_v18  ;;  %v338_v39 = vpack.c.bf16 %v34_v35, %v33_v34  ;;  %v36_v41 = vld [vmem:[%s527_s1 + $0x78] sm:$0xff]  ;;  %v359_v42 = vpack.c.bf16 %v126_v38, %v125_v37  ;;  %v127_v43 = vld [vmem:[%s528_s3 + $0x60] sm:$0xff]  ;;  %v128_v44 = vld [vmem:[%s528_s3 + $0x68] sm:$0xff] }
   0xb   :  { %349 = vmatprep.subr.bf16.mxu1 %v370_v0  ;;  %v341_v45 = vpack.c.bf16 %v36_v41, %v35_v40  ;;  %v362_v46 = vpack.c.bf16 %v128_v44, %v127_v43  ;;  %v20_v47 = vld [vmem:[%s529_s0] sm:$0xff]  ;;  %v129_v48 = vld [vmem:[%s528_s3 + $0x70] sm:$0xff]  ;;  %v130_v49 = vld [vmem:[%s528_s3 + $0x78] sm:$0xff] }
   0xc   :  { %327 = vmatpush3.bf16.msra.mxu0 %v326_v14  ;;  %v365_v50 = vpack.c.bf16 %v130_v49, %v129_v48  ;;  %v213_v51 = vld [vmem:[%s530_s2] ss:$0 sm:$0xff] }
   0xd   :  { %328 = vmatprep.subr.bf16.mxu0 %v370_v0  ;;  %v214_v56 = vld [vmem:[%s531_s4] ss:$0 sm:$0xff] }
   0xe   :  { %351 = vmatpush3.bf16.msra.mxu1 %v350_v24 }
   0xf   :  { %352 = vmatprep.subr.bf16.mxu1 %v370_v0 }
  0x10   :  { %330 = vmatpush3.bf16.msra.mxu0 %v329_v21 }
  0x11   :  { %331 = vmatprep.subr.bf16.mxu0 %v370_v0 }
  0x12   :  { %354 = vmatpush3.bf16.msra.mxu1 %v353_v30 }
  0x13   :  { %355 = vmatprep.subr.bf16.mxu1 %v370_v0 }
  0x14   :  { %333 = vmatpush3.bf16.msra.mxu0 %v332_v27 }
  0x15   :  { %334 = vmatprep.subr.bf16.mxu0 %v370_v0 }
  0x16   :  { %357 = vmatpush3.bf16.msra.mxu1 %v356_v36 }
  0x17   :  { %358 = vmatprep.subr.bf16.mxu1 %v370_v0 }
  0x18   :  { %336 = vmatpush3.bf16.msra.mxu0 %v335_v33 }
  0x19   :  { %337 = vmatprep.subr.bf16.mxu0 %v370_v0 }
  0x1a   :  { %360 = vmatpush3.bf16.msra.mxu1 %v359_v42 }
  0x1b   :  { %361 = vmatprep.subr.bf16.mxu1 %v370_v0 }
  0x1c   :  { %339 = vmatpush3.bf16.msra.mxu0 %v338_v39 }
  0x1d   :  { %340 = vmatprep.subr.bf16.mxu0 %v370_v0 }
  0x1e   :  { %363 = vmatpush3.bf16.msra.mxu1 %v362_v46 }
  0x1f   :  { %364 = vmatprep.subr.bf16.mxu1 %v370_v0 }
  0x20   :  { %342 = vmatpush3.bf16.msra.mxu0 %v341_v45 }
  0x22   :  { %366 = vmatpush3.bf16.msra.mxu1 %v365_v50 }
  0x23   :  { %282 = vmatmul.mubr.f32.vlgmr.msra.gmra.mrb[0].mxu0 %v20_v47 }
  0xf6   :  { %v110_v52 = vpop.f32.mrb[0].mxu0 }
  0xf7   :  { %v111_v53 = vadd.f32 %v213_v51, %v110_v52  ;;  %v283_v54 = vpop.f32.mrb[1].mxu0 }
  0xf9   :  { %v114_v55 = vmax.f32 %v111_v53, 0.0 }
  0xfb   :  { %317 = vmatmul.mubr.f32.vlgmr.msra.gmra.mrb[0].mxu1 %v114_v55 }
 0x1ce   :  { %v204_v57 = vpop.f32.mrb[0].mxu1 }
 0x1cf   :  { %v205_v58 = vadd.f32 %v214_v56, %v204_v57  ;;  %v318_v59 = vpop.f32.mrb[1].mxu1 }
 0x1d1   :  { %208 = vst [vmem:[%s532_s5] sm:$0xff] %v205_v58 }

</bundles_post_ra>
